<compile_context>
chip_gen: v6e
topology: v6e:2x2x1
jax: 0.10.0
libtpu: 0.0.40
codegen_flags: <defaults>
</compile_context>

<pallas_src>
import functools

import numpy as np
import jax
import jax.numpy as jnp
from jax.experimental import pallas as pl
from jax.experimental.pallas import tpu as pltpu


def _classify_kernel(heads, xt_ref, act_ref, rew_ref, sub_ref, out_ref):
    """One grid step over a tile of samples.

    xt_ref:  (T, du)       out_ref: (T, heads*(du+da) + heads)
    act_ref: (heads, da)   layout per row:
    rew_ref: (T, 1)          [ x*m_0 | a_0*m_0 | x*m_1 | a_1*m_1 | ... | mask ]
    sub_ref: (T, heads)
    """
    x = xt_ref[...]                                    # (T, du)
    a = act_ref[...]                                   # (heads, da)
    rew = rew_ref[...]                                 # (T, 1)
    sub = sub_ref[...]                                 # (T, heads)

    # Selection mask computed once, reused for every head slice and the packed mask.
    sel = jnp.logical_and(rew == 1.0, sub >= 0.1)      # (T, heads)

    # Build the whole lane-dense output row in registers, store once.
    pieces = []
    for h in range(heads):                             # heads is a static constant
        sel_h = sel[:, h:h + 1]                        # (T, 1)
        pieces.append(jnp.where(sel_h, x, 0.0))        # (T, du)
        pieces.append(jnp.where(sel_h, a[h:h + 1, :], 0.0))  # (T, da) via broadcast
    pieces.append(sel.astype(jnp.float32))             # packed mask, (T, heads)
    out_ref[...] = jnp.concatenate(pieces, axis=-1)    # single full-tile store


def _pick_tile_n(n):
    # Largest convenient sample tile that divides N and satisfies the (8,*) rule.
    if n <= 512:
        return n
    for t in (512, 256, 128, 64, 32, 16, 8):
        if n % t == 0:
            return t
    return n


@functools.partial(jax.jit, static_argnames=("heads",))
def classify_pallas(xt, action, rewards, subset, heads):
    """Dense Pallas forward.

    xt:      (N, du)       float32
    action:  (heads, da)   float32  (the chunked action rows)
    rewards: (N,)          float32  (1.0 marks a positive-reward sample)
    subset:  (N, heads)    float32
    returns: out (N, heads, du+da), mask (N, heads)  -- float32
    """
    N, du = xt.shape
    da = action.shape[1]
    M = du + da
    W = heads * M + heads                              # lane-dense slab width

    xt = xt.astype(jnp.float32)
    action = action.astype(jnp.float32)
    rew2 = rewards.reshape(N, 1).astype(jnp.float32)
    subset = subset.astype(jnp.float32)

    tile_n = _pick_tile_n(N)
    grid = (pl.cdiv(N, tile_n),)

    slab = pl.pallas_call(
        functools.partial(_classify_kernel, heads),
        out_shape=jax.ShapeDtypeStruct((N, W), jnp.float32),
        grid=grid,
        in_specs=[
            pl.BlockSpec((tile_n, du), lambda i: (i, 0)),      # xt
            pl.BlockSpec((heads, da), lambda i: (0, 0)),       # action (replicated)
            pl.BlockSpec((tile_n, 1), lambda i: (i, 0)),       # rewards
            pl.BlockSpec((tile_n, heads), lambda i: (i, 0)),   # subset
        ],
        out_specs=pl.BlockSpec((tile_n, W), lambda i: (i, 0)),
        compiler_params=pltpu.CompilerParams(
            dimension_semantics=("parallel",)),
    )(xt, action, rew2, subset)

    out = slab[:, :heads * M].reshape(N, heads, M)     # cheap slice + metadata reshape
    mask = slab[:, heads * M:]                         # (N, heads)
    return out, mask


def classify_forward(xt, action, rewards, subset, heads):
    """Reproduces the PyTorch return value: a list (per head) of (1, du+da) rows."""
    out, mask = classify_pallas(xt, action, rewards, subset, heads)
    out, mask = jax.device_get((out, mask))            # single sync / D2H copy
    scumu = []
    for h in range(heads):
        idx = np.nonzero(mask[:, h] > 0.5)[0]
        rows = out[idx, h, :]                          # one vectorized gather
        scumu.append([rows[j:j + 1] for j in range(rows.shape[0])])
    return scumu, out, mask


def _reference(xt, action, rewards, subset, heads):
    """Pure-numpy replica of the PyTorch forward (single call, empty state)."""
    xt = np.asarray(xt); action = np.asarray(action)
    rewards = np.asarray(rewards); subset = np.asarray(subset)
    list_r1 = [i for i, v in enumerate(rewards) if v == 1]
    scumu = [[] for _ in range(heads)]
    for h in range(heads):
        for i in list_r1:
            if subset[i][h] >= 0.1:
                medium = np.concatenate(
                    [xt[i].reshape(1, -1), action[h].reshape(1, -1)], axis=1)
                scumu[h].append(medium)
    return scumu


if __name__ == "__main__":
    # Small deterministic shapes implied by the module:
    duser, daction, heads, K = 8, 8, 4, 4
    N = 16  # number of samples in xt / rewards / subset

    key = jax.random.PRNGKey(0)
    k1, k2, k3, k4 = jax.random.split(key, 4)

    xt = jax.random.normal(k1, (N, duser), dtype=jnp.float32)
    # `action` in __init__ is chunked into `heads` rows of size (1, daction)
    action = jax.random.normal(k2, (heads, daction), dtype=jnp.float32)
    rewards = (jax.random.uniform(k3, (N,)) > 0.5).astype(jnp.float32)   # 0/1 rewards
    subset = jax.random.uniform(k4, (N, heads), dtype=jnp.float32)

    scumu, out, mask = classify_forward(xt, action, rewards, subset, heads)

    # Check against a pure-numpy replica of the PyTorch logic.
    ref = _reference(xt, action, rewards, subset, heads)
    assert len(scumu) == len(ref)
    for h in range(heads):
        assert len(scumu[h]) == len(ref[h]), (h, len(scumu[h]), len(ref[h]))
        for got, exp in zip(scumu[h], ref[h]):
            np.testing.assert_allclose(got, exp, rtol=1e-6, atol=1e-6)

    jax.block_until_ready(classify_pallas(xt, action, rewards, subset, heads))
    print("KERNEL_OK")
</pallas_src>

<mosaic_0001>
module attributes {stable_mosaic.version = 11 : i64} {
  func.func @_classify_kernel(%arg0: i32, %arg1: memref<16x8xf32, #tpu.memory_space<vmem>>, %arg2: memref<4x8xf32, #tpu.memory_space<vmem>>, %arg3: memref<16x1xf32, #tpu.memory_space<vmem>>, %arg4: memref<16x4xf32, #tpu.memory_space<vmem>>, %arg5: memref<16x68xf32, #tpu.memory_space<vmem>>) attributes {dimension_semantics = [#tpu.dimension_semantics<parallel>], iteration_bounds = array<i64: 1>, scalar_prefetch = 0 : i64, scratch_operands = 0 : i64, tpu.core_type = #tpu.core_type<tc>, window_params = [{transform_indices = @transform_0, window_bounds = array<i64: 16, 8>}, {pipeline_mode = #tpu.pipeline_mode<synchronous>, transform_indices = @transform_1, window_bounds = array<i64: 4, 8>}, {transform_indices = @transform_2, window_bounds = array<i64: 16, 1>}, {transform_indices = @transform_3, window_bounds = array<i64: 16, 4>}, {transform_indices = @transform_4, window_bounds = array<i64: 16, 68>}]} {
    %c0 = arith.constant 0 : index
    %c0_0 = arith.constant 0 : index
    %0 = vector.load %arg1[%c0, %c0_0] : memref<16x8xf32, #tpu.memory_space<vmem>>, vector<16x8xf32>
    %c0_1 = arith.constant 0 : index
    %c0_2 = arith.constant 0 : index
    %1 = vector.load %arg2[%c0_1, %c0_2] : memref<4x8xf32, #tpu.memory_space<vmem>>, vector<4x8xf32>
    %c0_3 = arith.constant 0 : index
    %c0_4 = arith.constant 0 : index
    %2 = vector.load %arg3[%c0_3, %c0_4] : memref<16x1xf32, #tpu.memory_space<vmem>>, vector<16x1xf32>
    %c0_5 = arith.constant 0 : index
    %c0_6 = arith.constant 0 : index
    %3 = vector.load %arg4[%c0_5, %c0_6] : memref<16x4xf32, #tpu.memory_space<vmem>>, vector<16x4xf32>
    %cst = arith.constant 1.000000e+00 : f32
    %4 = vector.broadcast %cst : f32 to vector<16x1xf32>
    %5 = arith.cmpf oeq, %2, %4 : vector<16x1xf32>
    %cst_7 = arith.constant 1.000000e-01 : f32
    %6 = vector.broadcast %cst_7 : f32 to vector<16x4xf32>
    %7 = arith.cmpf oge, %3, %6 : vector<16x4xf32>
    %8 = vector.broadcast %5 : vector<16x1xi1> to vector<16x4xi1>
    %9 = arith.andi %8, %7 : vector<16x4xi1>
    %10 = vector.extract_strided_slice %9 {offsets = [0, 0], sizes = [16, 1], strides = [1, 1]} : vector<16x4xi1> to vector<16x1xi1>
    %cst_8 = arith.constant 0.000000e+00 : f32
    %11 = vector.shape_cast %10 : vector<16x1xi1> to vector<16x1xi1>
    %12 = vector.broadcast %11 : vector<16x1xi1> to vector<16x8xi1>
    %13 = vector.broadcast %cst_8 : f32 to vector<16x8xf32>
    %14 = arith.select %12, %0, %13 : vector<16x8xi1>, vector<16x8xf32>
    %15 = vector.extract_strided_slice %1 {offsets = [0, 0], sizes = [1, 8], strides = [1, 1]} : vector<4x8xf32> to vector<1x8xf32>
    %cst_9 = arith.constant 0.000000e+00 : f32
    %16 = vector.shape_cast %10 : vector<16x1xi1> to vector<16x1xi1>
    %17 = vector.broadcast %16 : vector<16x1xi1> to vector<16x8xi1>
    %18 = vector.shape_cast %15 : vector<1x8xf32> to vector<1x8xf32>
    %19 = vector.broadcast %18 : vector<1x8xf32> to vector<16x8xf32>
    %20 = vector.broadcast %cst_9 : f32 to vector<16x8xf32>
    %21 = arith.select %17, %19, %20 : vector<16x8xi1>, vector<16x8xf32>
    %22 = vector.extract_strided_slice %9 {offsets = [0, 1], sizes = [16, 1], strides = [1, 1]} : vector<16x4xi1> to vector<16x1xi1>
    %cst_10 = arith.constant 0.000000e+00 : f32
    %23 = vector.shape_cast %22 : vector<16x1xi1> to vector<16x1xi1>
    %24 = vector.broadcast %23 : vector<16x1xi1> to vector<16x8xi1>
    %25 = vector.broadcast %cst_10 : f32 to vector<16x8xf32>
    %26 = arith.select %24, %0, %25 : vector<16x8xi1>, vector<16x8xf32>
    %27 = vector.extract_strided_slice %1 {offsets = [1, 0], sizes = [1, 8], strides = [1, 1]} : vector<4x8xf32> to vector<1x8xf32>
    %cst_11 = arith.constant 0.000000e+00 : f32
    %28 = vector.shape_cast %22 : vector<16x1xi1> to vector<16x1xi1>
    %29 = vector.broadcast %28 : vector<16x1xi1> to vector<16x8xi1>
    %30 = vector.shape_cast %27 : vector<1x8xf32> to vector<1x8xf32>
    %31 = vector.broadcast %30 : vector<1x8xf32> to vector<16x8xf32>
    %32 = vector.broadcast %cst_11 : f32 to vector<16x8xf32>
    %33 = arith.select %29, %31, %32 : vector<16x8xi1>, vector<16x8xf32>
    %34 = vector.extract_strided_slice %9 {offsets = [0, 2], sizes = [16, 1], strides = [1, 1]} : vector<16x4xi1> to vector<16x1xi1>
    %cst_12 = arith.constant 0.000000e+00 : f32
    %35 = vector.shape_cast %34 : vector<16x1xi1> to vector<16x1xi1>
    %36 = vector.broadcast %35 : vector<16x1xi1> to vector<16x8xi1>
    %37 = vector.broadcast %cst_12 : f32 to vector<16x8xf32>
    %38 = arith.select %36, %0, %37 : vector<16x8xi1>, vector<16x8xf32>
    %39 = vector.extract_strided_slice %1 {offsets = [2, 0], sizes = [1, 8], strides = [1, 1]} : vector<4x8xf32> to vector<1x8xf32>
    %cst_13 = arith.constant 0.000000e+00 : f32
    %40 = vector.shape_cast %34 : vector<16x1xi1> to vector<16x1xi1>
    %41 = vector.broadcast %40 : vector<16x1xi1> to vector<16x8xi1>
    %42 = vector.shape_cast %39 : vector<1x8xf32> to vector<1x8xf32>
    %43 = vector.broadcast %42 : vector<1x8xf32> to vector<16x8xf32>
    %44 = vector.broadcast %cst_13 : f32 to vector<16x8xf32>
    %45 = arith.select %41, %43, %44 : vector<16x8xi1>, vector<16x8xf32>
    %46 = vector.extract_strided_slice %9 {offsets = [0, 3], sizes = [16, 1], strides = [1, 1]} : vector<16x4xi1> to vector<16x1xi1>
    %cst_14 = arith.constant 0.000000e+00 : f32
    %47 = vector.shape_cast %46 : vector<16x1xi1> to vector<16x1xi1>
    %48 = vector.broadcast %47 : vector<16x1xi1> to vector<16x8xi1>
    %49 = vector.broadcast %cst_14 : f32 to vector<16x8xf32>
    %50 = arith.select %48, %0, %49 : vector<16x8xi1>, vector<16x8xf32>
    %51 = vector.extract_strided_slice %1 {offsets = [3, 0], sizes = [1, 8], strides = [1, 1]} : vector<4x8xf32> to vector<1x8xf32>
    %cst_15 = arith.constant 0.000000e+00 : f32
    %52 = vector.shape_cast %46 : vector<16x1xi1> to vector<16x1xi1>
    %53 = vector.broadcast %52 : vector<16x1xi1> to vector<16x8xi1>
    %54 = vector.shape_cast %51 : vector<1x8xf32> to vector<1x8xf32>
    %55 = vector.broadcast %54 : vector<1x8xf32> to vector<16x8xf32>
    %56 = vector.broadcast %cst_15 : f32 to vector<16x8xf32>
    %57 = arith.select %53, %55, %56 : vector<16x8xi1>, vector<16x8xf32>
    %58 = arith.extui %9 : vector<16x4xi1> to vector<16x4xi32>
    %59 = arith.sitofp %58 : vector<16x4xi32> to vector<16x4xf32>
    %60 = tpu.concatenate %14, %21, %26, %33, %38, %45, %50, %57, %59 in 1 : vector<16x8xf32>, vector<16x8xf32>, vector<16x8xf32>, vector<16x8xf32>, vector<16x8xf32>, vector<16x8xf32>, vector<16x8xf32>, vector<16x8xf32>, vector<16x4xf32> -> vector<16x68xf32>
    %c0_16 = arith.constant 0 : index
    %c0_17 = arith.constant 0 : index
    %61 = vector.load %arg5[%c0_16, %c0_17] : memref<16x68xf32, #tpu.memory_space<vmem>>, vector<16x68xf32>
    tpu.vector_store %arg5[%c0_16, %c0_17], %60 {strides = array<i32>} : memref<16x68xf32, #tpu.memory_space<vmem>>, vector<16x68xf32>,
    return
  }
  func.func @transform_0(%arg0: i32) -> (i32, i32) {
    %c0_i32 = arith.constant 0 : i32
    %c0_i32_0 = arith.constant 0 : i32
    return %arg0, %c0_i32 : i32, i32
  }
  func.func @transform_1(%arg0: i32) -> (i32, i32) {
    %c0_i32 = arith.constant 0 : i32
    %c0_i32_0 = arith.constant 0 : i32
    %c0_i32_1 = arith.constant 0 : i32
    return %c0_i32, %c0_i32_0 : i32, i32
  }
  func.func @transform_2(%arg0: i32) -> (i32, i32) {
    %c0_i32 = arith.constant 0 : i32
    %c0_i32_0 = arith.constant 0 : i32
    return %arg0, %c0_i32 : i32, i32
  }
  func.func @transform_3(%arg0: i32) -> (i32, i32) {
    %c0_i32 = arith.constant 0 : i32
    %c0_i32_0 = arith.constant 0 : i32
    return %arg0, %c0_i32 : i32, i32
  }
  func.func @transform_4(%arg0: i32) -> (i32, i32) {
    %c0_i32 = arith.constant 0 : i32
    %c0_i32_0 = arith.constant 0 : i32
    return %arg0, %c0_i32 : i32, i32
  }
}

</mosaic_0001>

<bundles_post_ra>
// kernel: classify_pallas.1
= control target key start
LH: loop header
LB: loop body
LE: loop exit
PB: predicated region body
PF: predicated region fallthrough
CT: control target
= control target key end

     0   :  { %v231_v0 = vmov 0   ;;  %v232_v5 = vmov 1   ;;  %v233_v11 = vmov 0.0   ;;  %v234_v16 = vmov 2   ;;  %s236_s25 = smov 8   ;;  %s238_s28 = smov 24   ;;  %s311_s2 = inlined_call_operand.vmem [shape: f32[16,1], index: 2, kind: input, shape index: {}]   ;;  %s312_s3 = inlined_call_operand.vmem [shape: f32[16,4], index: 3, kind: input, shape index: {}]   ;;  %s313_s1 = inlined_call_operand.vmem [shape: f32[4,8], index: 1, kind: input, shape index: {}]   ;;  %s314_s0 = inlined_call_operand.vmem [shape: f32[16,8], index: 0, kind: input, shape index: {}]   ;;  %s315_s4 = inlined_call_operand.vmem [shape: f32[16,68], index: 4, kind: output, shape index: {}]  }
   0x1   :  { %218 = vset.pattern.permute.xlu0 %v231_v0  ;;  %v20_v1 = vld [vmem:[%s311_s2] sm:$0xff]  ;;  %v21_v2 = vld [vmem:[%s311_s2 + $0x8] sm:$0xff]  ;;  %219 = vset.pattern.permute.xlu1 %v231_v0  ;;  %v235_v17 = vmov 3   ;;  %v52_v18 = vlaneseq  ;;  %s240_s29 = smov 40   ;;  %s241_s30 = smov 48  }
   0x2   :  { %vm24_vm0 = vcmp.eq.f32.partialorder %v20_v1, 1.0  ;;  %vm25_vm1 = vcmp.eq.f32.partialorder %v21_v2, 1.0  ;;  %v22_v6 = vld [vmem:[%s312_s3] sm:$0xff]  ;;  %v23_v8 = vld [vmem:[%s312_s3 + $0x8] sm:$0xff]  ;;  %s242_s5 = smov 56   ;;  %s243_s6 = smov 64  }
   0x3   :  { %v28_v3 = vsel %vm24_vm0, 1, %v231_v0  ;;  %v29_v4 = vsel %vm25_vm1, 1, %v231_v0  ;;  %vm26_vm2 = vcmp.ge.f32.partialorder %v22_v6, 0.1  ;;  %vm27_vm5 = vcmp.ge.f32.partialorder %v23_v8, 0.1 }
   0x4   :  { %31 = vperm.xlu0 %218, %v28_v3   ;;  %v53_v19 = vshrl.u32 %v52_v18, 7  ;;  %v19_v21 = vld [vmem:[%s313_s1] sm:$0xf]  ;;  %v18_v29 = vld [vmem:[%s314_s0 + $0x8] sm:$0xff]  ;;  %s237_s1 = smov 16   ;;  %vm172_vm0 = vcmask 64512  }
   0x5   :  { %v17_v23 = vld [vmem:[%s314_s0] sm:$0xff]  ;;  %s239_s0 = smov 32   ;;  %vm175_vm1 = vcmask 130048  }
   0x6   :  { %v54_v20 = vsub.s32 0, %v53_v19  ;;  %v70_v28 = vsub.s32 1, %v53_v19  ;;  %v86_v39 = vsub.s32 2, %v53_v19  ;;  %v102_v47 = vsub.s32 3, %v53_v19 }
   0x8   :  { %34 = vperm.xlu0 %218, %v29_v4   ;;  %v55_v22 = vrot.slane %v19_v21, %v54_v20  ;;  %v71_v32 = vrot.slane %v19_v21, %v70_v28  ;;  %v87_v43 = vrot.slane %v19_v21, %v86_v39  ;;  %v103_v51 = vrot.slane %v19_v21, %v102_v47 }
   0xc   :  { %220 = vset.pattern.permute.xlu0 %v232_v5 }
  0x7f   :  { %v32_v7 = vpop.permute.xlu0 %31 }
  0x80   :  { %vm36_vm3 = vcmp.eq.s32.totalorder %v32_v7, 1 }
  0x81   :  { %vm38_vm4 = vmand %vm36_vm3, %vm26_vm2  ;;  %vm178_vm2 = vcmask 195584   ;;  %vm181_vm3 = vcmask 261120  }
  0x82   :  { %v40_v9 = vsel %vm38_vm4, 1, %v231_v0  ;;  %v281_v12 = vsel %vm38_vm4, 1.0, %v233_v11  ;;  %vm184_vm4 = vcmask 326656  }
  0x83   :  { %59 = vperm.xlu0 %220, %v40_v9   ;;  %43 = vperm.xlu1 %219, %v40_v9   ;;  %v35_v10 = vpop.permute.xlu0 %34 }
  0x84   :  { %vm37_vm6 = vcmp.eq.s32.totalorder %v35_v10, 1 }
  0x85   :  { %vm39_vm7 = vmand %vm37_vm6, %vm27_vm5  ;;  %vm187_vm5 = vcmask 392192   ;;  %vm190_vm6 = vcmask 457728  }
  0x86   :  { %v283_v13 = vsel %vm39_vm7, 1.0, %v233_v11  ;;  %v41_v14 = vsel %vm39_vm7, 1, %v231_v0  ;;  %vm193_vm7 = vcmask 523264  }
  0x87   :  { %v225_v15 = vpack.i.bf16 %v283_v13, %v281_v12  ;;  %223 = vset.pattern.permute.xlu0 %v234_v16  ;;  %46 = vperm.xlu1 %219, %v41_v14  }
  0x88   :  { %78 = vperm.xlu0 %223, %v41_v14  }
  0x8b   :  { %221 = vset.pattern.permute.xlu1 %v232_v5 }
  0x8c   :  { %62 = vperm.xlu1 %221, %v41_v14   ;;  %230 = vset.pattern.permute.xlu0 %v235_v17 }
  0x90   :  { %222 = vset.pattern.permute.xlu1 %v234_v16 }
  0x91   :  { %75 = vperm.xlu1 %222, %v40_v9  }
  0x95   :  { %224 = vset.pattern.permute.xlu1 %v235_v17 }
  0x96   :  { %91 = vperm.xlu1 %224, %v40_v9  }
  0x9a   :  { %94 = vperm.xlu1 %224, %v41_v14  }
  0xfe   :  { %v44_v24 = vpop.permute.xlu1 %43  ;;  %v60_v25 = vpop.permute.xlu0 %59 }
  0xff   :  { %vm48_vm8 = vcmp.eq.s32.totalorder %v44_v24, 1  ;;  %vm64_vm9 = vcmp.eq.s32.totalorder %v60_v25, 1 }
 0x100   :  { %v293_v26 = vsel %vm48_vm8, %v17_v23, 0.0  ;;  %v56_v27 = vsel %vm48_vm8, %v55_v22, 0.0  ;;  %v66_v31 = vsel %vm64_vm9, %v17_v23, 0.0  ;;  %v72_v36 = vsel %vm64_vm9, %v71_v32, 0.0 }
 0x101   :  { %110 = vrot.lane.b32.xlu0 %v56_v27, %s236_s25  ;;  %vm196_vm8 = vcmask 556032  }
 0x102   :  { %v47_v30 = vpop.permute.xlu1 %46 }
 0x103   :  { %vm49_vm10 = vcmp.eq.s32.totalorder %v47_v30, 1  ;;  %v79_v38 = vpop.permute.xlu0 %78 }
 0x104   :  { %v298_v33 = vsel %vm49_vm10, %v18_v29, 0.0  ;;  %v57_v34 = vsel %vm49_vm10, %v55_v22, 0.0  ;;  %vm81_vm13 = vcmp.eq.s32.totalorder %v79_v38, 1 }
 0x105   :  { %112 = vrot.lane.b32.xlu1 %v57_v34, %s236_s25  ;;  %118 = vrot.lane.b32.xlu0 %v66_v31, %s237_s1  ;;  %v83_v44 = vsel %vm81_vm13, %v18_v29, 0.0  ;;  %v89_v48 = vsel %vm81_vm13, %v87_v43, 0.0 }
 0x107   :  { %v63_v35 = vpop.permute.xlu1 %62 }
 0x108   :  { %vm65_vm11 = vcmp.eq.s32.totalorder %v63_v35, 1 }
 0x109   :  { %v67_v37 = vsel %vm65_vm11, %v18_v29, 0.0  ;;  %126 = vrot.lane.b32.xlu0 %v72_v36, %s238_s28  ;;  %v73_v41 = vsel %vm65_vm11, %v71_v32, 0.0 }
 0x10a   :  { %120 = vrot.lane.b32.xlu1 %v67_v37, %s237_s1 }
 0x10c   :  { %v76_v40 = vpop.permute.xlu1 %75 }
 0x10d   :  { %vm80_vm12 = vcmp.eq.s32.totalorder %v76_v40, 1 }
 0x10e   :  { %v82_v42 = vsel %vm80_vm12, %v17_v23, 0.0  ;;  %128 = vrot.lane.b32.xlu1 %v73_v41, %s238_s28  ;;  %v88_v46 = vsel %vm80_vm12, %v87_v43, 0.0 }
 0x10f   :  { %134 = vrot.lane.b32.xlu0 %v82_v42, %s239_s0 }
 0x111   :  { %v92_v45 = vpop.permute.xlu1 %91 }
 0x112   :  { %136 = vrot.lane.b32.xlu1 %v83_v44, %s239_s0  ;;  %vm96_vm14 = vcmp.eq.s32.totalorder %v92_v45, 1 }
 0x113   :  { %142 = vrot.lane.b32.xlu0 %v88_v46, %s240_s29  ;;  %v98_v50 = vsel %vm96_vm14, %v17_v23, 0.0  ;;  %v104_v53 = vsel %vm96_vm14, %v103_v51, 0.0 }
 0x115   :  { %v95_v49 = vpop.permute.xlu1 %94 }
 0x116   :  { %vm97_vm15 = vcmp.eq.s32.totalorder %v95_v49, 1  ;;  %144 = vrot.lane.b32.xlu1 %v89_v48, %s240_s29 }
 0x117   :  { %150 = vrot.lane.b32.xlu0 %v98_v50, %s241_s30  ;;  %v99_v52 = vsel %vm97_vm15, %v18_v29, 0.0  ;;  %v105_v54 = vsel %vm97_vm15, %v103_v51, 0.0 }
 0x11a   :  { %152 = vrot.lane.b32.xlu1 %v99_v52, %s241_s30 }
 0x11b   :  { %158 = vrot.lane.b32.xlu0 %v104_v53, %s242_s5 }
 0x11e   :  { %160 = vrot.lane.b32.xlu1 %v105_v54, %s242_s5 }
 0x11f   :  { %226 = vrot.lane.b32.xlu0 %v225_v15, %s243_s6 }
 0x173   :  { %v111_v55 = vpop.permute.xlu0 %110 }
 0x174   :  { %v173_v3 = vsel %vm172_vm0, %v293_v26, %v111_v55 }
 0x177   :  { %v113_v56 = vpop.permute.xlu1 %112  ;;  %v119_v57 = vpop.permute.xlu0 %118 }
 0x178   :  { %v174_v4 = vsel %vm172_vm0, %v298_v33, %v113_v56  ;;  %v176_v6 = vsel %vm175_vm1, %v173_v3, %v119_v57 }
 0x17b   :  { %v127_v59 = vpop.permute.xlu0 %126 }
 0x17c   :  { %v121_v58 = vpop.permute.xlu1 %120  ;;  %v179_v8 = vsel %vm178_vm2, %v176_v6, %v127_v59 }
 0x17d   :  { %v177_v7 = vsel %vm175_vm1, %v174_v4, %v121_v58 }
 0x180   :  { %v129_v60 = vpop.permute.xlu1 %128 }
 0x181   :  { %v135_v61 = vpop.permute.xlu0 %134  ;;  %v180_v9 = vsel %vm178_vm2, %v177_v7, %v129_v60 }
 0x182   :  { %v182_v10 = vsel %vm181_vm3, %v179_v8, %v135_v61 }
 0x184   :  { %v137_v62 = vpop.permute.xlu1 %136 }
 0x185   :  { %v143_v63 = vpop.permute.xlu0 %142  ;;  %v183_v11 = vsel %vm181_vm3, %v180_v9, %v137_v62 }
 0x186   :  { %v185_v13 = vsel %vm184_vm4, %v182_v10, %v143_v63 }
 0x188   :  { %v145_v0 = vpop.permute.xlu1 %144 }
 0x189   :  { %v151_v1 = vpop.permute.xlu0 %150  ;;  %v186_v14 = vsel %vm184_vm4, %v183_v11, %v145_v0 }
 0x18a   :  { %v188_v16 = vsel %vm187_vm5, %v185_v13, %v151_v1 }
 0x18c   :  { %v153_v2 = vpop.permute.xlu1 %152 }
 0x18d   :  { %v159_v5 = vpop.permute.xlu0 %158  ;;  %v189_v17 = vsel %vm187_vm5, %v186_v14, %v153_v2 }
 0x18e   :  { %v191_v20 = vsel %vm190_vm6, %v188_v16, %v159_v5 }
 0x190   :  { %v161_v12 = vpop.permute.xlu1 %160 }
 0x191   :  { %v227_v15 = vpop.permute.xlu0 %226  ;;  %v192_v21 = vsel %vm190_vm6, %v189_v17, %v161_v12 }
 0x192   :  { %v229_v18 = vunpack.i.h.bf16 %v227_v15  ;;  %v228_v19 = vunpack.i.l.bf16 %v227_v15 }
 0x194   :  { %v195_v22 = vsel %vm193_vm7, %v192_v21, %v229_v18  ;;  %v194_v23 = vsel %vm193_vm7, %v191_v20, %v228_v19 }
 0x195   :  { %198 = vst.msk [vmem:[%s315_s4 + $0x8] sm:$0xff] %vm196_vm8, %v195_v22  ;;  %197 = vst.msk [vmem:[%s315_s4] sm:$0xff] %vm196_vm8, %v194_v23 }

</bundles_post_ra>
